<compile_context>
chip_gen: v7x
topology: tpu7x:2x2x1
jax: 0.10.0
libtpu: 0.0.40
codegen_flags: <defaults>
</compile_context>

<pallas_src>
import functools

import jax
import jax.numpy as jnp
from jax import lax
from jax.experimental import pallas as pl
from jax.experimental.pallas import tpu as pltpu


def _round_up(x, m):
    return (x + m - 1) // m * m


def _projector_kernel(x_ref, w1_ref, b1_ref, w2_ref, b2_ref, gamma_ref, beta_ref,
                      o_ref, *, d_out):
    # ---- Linear 1 on the MXU: bf16 inputs, f32 accumulation ----
    h = jnp.dot(x_ref[...], w1_ref[...], preferred_element_type=jnp.float32)
    h = h + b1_ref[...]

    # ---- GELU (exact, erf-based, matching torch.nn.GELU default) ----
    inv_sqrt2 = 0.7071067811865476
    h = 0.5 * h * (1.0 + lax.erf(h * inv_sqrt2))

    # ---- Dropout: identity in eval mode (no scratch round-trip) ----
    # TODO(synk): training-mode dropout (pltpu.prng_random_bits mask) not implemented.

    # ---- Linear 2 on the MXU: bf16 inputs, f32 accumulation ----
    y = jnp.dot(h.astype(w2_ref.dtype), w2_ref[...],
                preferred_element_type=jnp.float32)
    y = y + b2_ref[...]

    # ---- LayerNorm over the true d_out lanes (padded lanes are exactly zero) ----
    # Fused mean / E[y^2] form: two cross-lane reductions instead of three.
    inv_n = 1.0 / d_out
    mean = jnp.sum(y, axis=-1, keepdims=True) * inv_n
    ex2 = jnp.sum(y * y, axis=-1, keepdims=True) * inv_n
    var = ex2 - mean * mean
    y_hat = (y - mean) * lax.rsqrt(var + 1e-5)
    o_ref[...] = (y_hat * gamma_ref[...] + beta_ref[...]).astype(o_ref.dtype)


@jax.jit
def contrastive_projector(x, w1, b1, w2, b2, gamma, beta):
    B, d_in = x.shape
    h_dim = w1.shape[1]
    d_out = w2.shape[1]

    matmul_dtype = jnp.bfloat16  # MXU operand dtype; accumulation stays f32.

    # Lane-dense padding of hidden / output feature dims. Zero-padded weight
    # columns/rows contribute exactly zero through GELU and the second matmul.
    h_p = _round_up(h_dim, 128)
    d_out_p = _round_up(d_out, 128)

    # Batch tiling: one grid step per batch tile (double-buffered DMA pipeline;
    # "parallel" semantics lets v7x shard tiles across its two TensorCores).
    block_b = min(512, _round_up(B, 8))
    b_p = _round_up(B, block_b)

    x_p = jnp.zeros((b_p, d_in), matmul_dtype).at[:B].set(x.astype(matmul_dtype))
    w1_p = jnp.zeros((d_in, h_p), matmul_dtype).at[:, :h_dim].set(w1.astype(matmul_dtype))
    b1_p = jnp.zeros((1, h_p), jnp.float32).at[:, :h_dim].set(b1.reshape(1, h_dim))
    w2_p = jnp.zeros((h_p, d_out_p), matmul_dtype).at[:h_dim, :d_out].set(w2.astype(matmul_dtype))
    b2_p = jnp.zeros((1, d_out_p), jnp.float32).at[:, :d_out].set(b2.reshape(1, d_out))
    g_p = jnp.zeros((1, d_out_p), jnp.float32).at[:, :d_out].set(gamma.reshape(1, d_out))
    bt_p = jnp.zeros((1, d_out_p), jnp.float32).at[:, :d_out].set(beta.reshape(1, d_out))

    # VMEM budget: double-buffered x / out tiles + resident params, 2x headroom,
    # floored at the 32 MiB default scoped limit (safe on v5e/v6e/v7x).
    vmem_bytes = (2 * block_b * d_in * 2
                  + 2 * block_b * d_out_p * 4
                  + 2 * (d_in * h_p * 2 + h_p * 4
                         + h_p * d_out_p * 2 + 3 * d_out_p * 4))
    vmem_limit = int(min(max(2 * vmem_bytes, 32 * 1024 * 1024), 128 * 1024 * 1024))

    tiled = lambda shape: pl.BlockSpec(shape, lambda i: (i, 0))
    resident = lambda shape: pl.BlockSpec(shape, lambda i: (0, 0))

    out_p = pl.pallas_call(
        functools.partial(_projector_kernel, d_out=d_out),
        out_shape=jax.ShapeDtypeStruct((b_p, d_out_p), jnp.float32),
        grid=(b_p // block_b,),
        in_specs=[
            tiled((block_b, d_in)),    # x tile (pipelined per grid step)
            resident((d_in, h_p)),     # w1 (VMEM-resident)
            resident((1, h_p)),        # b1
            resident((h_p, d_out_p)),  # w2
            resident((1, d_out_p)),    # b2
            resident((1, d_out_p)),    # gamma
            resident((1, d_out_p)),    # beta
        ],
        out_specs=tiled((block_b, d_out_p)),
        compiler_params=pltpu.CompilerParams(
            dimension_semantics=("parallel",),
            vmem_limit_bytes=vmem_limit),
    )(x_p, w1_p, b1_p, w2_p, b2_p, g_p, bt_p)

    return out_p[:B, :d_out]


def reference(x, w1, b1, w2, b2, gamma, beta):
    # Mixed-precision-aware reference (bf16 MXU operands, f32 accumulation),
    # otherwise identical math to the PyTorch module.
    mm = jnp.bfloat16
    h = jnp.dot(x.astype(mm), w1.astype(mm), preferred_element_type=jnp.float32) + b1
    h = 0.5 * h * (1.0 + lax.erf(h * 0.7071067811865476))
    y = jnp.dot(h.astype(mm), w2.astype(mm), preferred_element_type=jnp.float32) + b2
    mean = jnp.mean(y, axis=-1, keepdims=True)
    var = jnp.mean((y - mean) ** 2, axis=-1, keepdims=True)
    return (y - mean) * lax.rsqrt(var + 1e-5) * gamma + beta


if __name__ == "__main__":
    # Module config (hidden_dim defaults to input_dim // 2)
    B, input_dim, output_dim = 8, 32, 16
    hidden_dim = input_dim // 2

    key = jax.random.PRNGKey(0)
    kx, k1, k2, k3, k4 = jax.random.split(key, 5)

    x = jax.random.normal(kx, (B, input_dim), dtype=jnp.float32)

    # Deterministic parameter init (shapes match nn.Linear / nn.LayerNorm).
    w1 = jax.random.normal(k1, (input_dim, hidden_dim), dtype=jnp.float32) * 0.1
    b1 = jax.random.normal(k2, (1, hidden_dim), dtype=jnp.float32) * 0.01
    w2 = jax.random.normal(k3, (hidden_dim, output_dim), dtype=jnp.float32) * 0.1
    b2 = jax.random.normal(k4, (1, output_dim), dtype=jnp.float32) * 0.01
    gamma = jnp.ones((1, output_dim), dtype=jnp.float32)
    beta = jnp.zeros((1, output_dim), dtype=jnp.float32)

    out = contrastive_projector(x, w1, b1, w2, b2, gamma, beta)
    out = jax.block_until_ready(out)

    ref = reference(x, w1, b1, w2, b2, gamma, beta)
    assert out.shape == (B, output_dim)
    assert jnp.allclose(out, ref, atol=1e-4, rtol=1e-4), (
        f"max abs err {jnp.max(jnp.abs(out - ref))}")

    print("KERNEL_OK")
</pallas_src>

<mosaic_0001>
module attributes {stable_mosaic.version = 11 : i64} {
  func.func @_projector_kernel(%arg0: i32, %arg1: memref<8x32xbf16, #tpu.memory_space<vmem>>, %arg2: memref<32x128xbf16, #tpu.memory_space<vmem>>, %arg3: memref<1x128xf32, #tpu.memory_space<vmem>>, %arg4: memref<128x128xbf16, #tpu.memory_space<vmem>>, %arg5: memref<1x128xf32, #tpu.memory_space<vmem>>, %arg6: memref<1x128xf32, #tpu.memory_space<vmem>>, %arg7: memref<1x128xf32, #tpu.memory_space<vmem>>, %arg8: memref<8x128xf32, #tpu.memory_space<vmem>>) attributes {dimension_semantics = [#tpu.dimension_semantics<parallel>], iteration_bounds = array<i64: 1>, scalar_prefetch = 0 : i64, scratch_operands = 0 : i64, tpu.core_type = #tpu.core_type<tc>, window_params = [{transform_indices = @transform_0, window_bounds = array<i64: 8, 32>}, {pipeline_mode = #tpu.pipeline_mode<synchronous>, transform_indices = @transform_1, window_bounds = array<i64: 32, 128>}, {pipeline_mode = #tpu.pipeline_mode<synchronous>, transform_indices = @transform_2, window_bounds = array<i64: 1, 128>}, {pipeline_mode = #tpu.pipeline_mode<synchronous>, transform_indices = @transform_3, window_bounds = array<i64: 128, 128>}, {pipeline_mode = #tpu.pipeline_mode<synchronous>, transform_indices = @transform_4, window_bounds = array<i64: 1, 128>}, {pipeline_mode = #tpu.pipeline_mode<synchronous>, transform_indices = @transform_5, window_bounds = array<i64: 1, 128>}, {pipeline_mode = #tpu.pipeline_mode<synchronous>, transform_indices = @transform_6, window_bounds = array<i64: 1, 128>}, {transform_indices = @transform_7, window_bounds = array<i64: 8, 128>}]} {
    %c0 = arith.constant 0 : index
    %c0_0 = arith.constant 0 : index
    %0 = vector.load %arg1[%c0, %c0_0] : memref<8x32xbf16, #tpu.memory_space<vmem>>, vector<8x32xbf16>
    %c0_1 = arith.constant 0 : index
    %c0_2 = arith.constant 0 : index
    %1 = vector.load %arg2[%c0_1, %c0_2] : memref<32x128xbf16, #tpu.memory_space<vmem>>, vector<32x128xbf16>
    %cst = arith.constant dense<0.000000e+00> : vector<8x128xf32>
    %2 = tpu.matmul %0, %1, %cst {dimension_numbers = #tpu.dot_dimension_numbers<[1], [0], [0], [1], [0, 0, 1, 1], [], []>} : vector<8x32xbf16>, vector<32x128xbf16>, vector<8x128xf32> -> vector<8x128xf32>
    %c0_3 = arith.constant 0 : index
    %c0_4 = arith.constant 0 : index
    %3 = vector.load %arg3[%c0_3, %c0_4] : memref<1x128xf32, #tpu.memory_space<vmem>>, vector<1x128xf32>
    %4 = vector.broadcast %3 : vector<1x128xf32> to vector<8x128xf32>
    %5 = arith.addf %2, %4 : vector<8x128xf32>
    %cst_5 = arith.constant 5.000000e-01 : f32
    %6 = vector.broadcast %cst_5 : f32 to vector<8x128xf32>
    %7 = arith.mulf %6, %5 : vector<8x128xf32>
    %cst_6 = arith.constant 0.707106769 : f32
    %8 = vector.broadcast %cst_6 : f32 to vector<8x128xf32>
    %9 = arith.mulf %5, %8 : vector<8x128xf32>
    %10 = math.erf %9 : vector<8x128xf32>
    %cst_7 = arith.constant 1.000000e+00 : f32
    %11 = vector.broadcast %cst_7 : f32 to vector<8x128xf32>
    %12 = arith.addf %11, %10 : vector<8x128xf32>
    %13 = arith.mulf %7, %12 : vector<8x128xf32>
    %14 = arith.truncf %13 : vector<8x128xf32> to vector<8x128xbf16>
    %c0_8 = arith.constant 0 : index
    %c0_9 = arith.constant 0 : index
    %15 = vector.load %arg4[%c0_8, %c0_9] : memref<128x128xbf16, #tpu.memory_space<vmem>>, vector<128x128xbf16>
    %cst_10 = arith.constant dense<0.000000e+00> : vector<8x128xf32>
    %16 = tpu.matmul %14, %15, %cst_10 {dimension_numbers = #tpu.dot_dimension_numbers<[1], [0], [0], [1], [0, 0, 1, 1], [], []>} : vector<8x128xbf16>, vector<128x128xbf16>, vector<8x128xf32> -> vector<8x128xf32>
    %c0_11 = arith.constant 0 : index
    %c0_12 = arith.constant 0 : index
    %17 = vector.load %arg5[%c0_11, %c0_12] : memref<1x128xf32, #tpu.memory_space<vmem>>, vector<1x128xf32>
    %18 = vector.broadcast %17 : vector<1x128xf32> to vector<8x128xf32>
    %19 = arith.addf %16, %18 : vector<8x128xf32>
    %cst_13 = arith.constant dense<0.000000e+00> : vector<8xf32>
    %20 = vector.multi_reduction <add>, %19, %cst_13 [1] : vector<8x128xf32> to vector<8xf32>
    %21 = vector.shape_cast %20 : vector<8xf32> to vector<8x1xf32>
    %cst_14 = arith.constant 6.250000e-02 : f32
    %22 = vector.broadcast %cst_14 : f32 to vector<8x1xf32>
    %23 = arith.mulf %21, %22 : vector<8x1xf32>
    %24 = arith.mulf %19, %19 : vector<8x128xf32>
    %cst_15 = arith.constant dense<0.000000e+00> : vector<8xf32>
    %25 = vector.multi_reduction <add>, %24, %cst_15 [1] : vector<8x128xf32> to vector<8xf32>
    %26 = vector.shape_cast %25 : vector<8xf32> to vector<8x1xf32>
    %cst_16 = arith.constant 6.250000e-02 : f32
    %27 = vector.broadcast %cst_16 : f32 to vector<8x1xf32>
    %28 = arith.mulf %26, %27 : vector<8x1xf32>
    %29 = arith.mulf %23, %23 : vector<8x1xf32>
    %30 = arith.subf %28, %29 : vector<8x1xf32>
    %31 = vector.broadcast %23 : vector<8x1xf32> to vector<8x128xf32>
    %32 = arith.subf %19, %31 : vector<8x128xf32>
    %cst_17 = arith.constant 9.99999974E-6 : f32
    %33 = vector.broadcast %cst_17 : f32 to vector<8x1xf32>
    %34 = arith.addf %30, %33 : vector<8x1xf32>
    %35 = math.rsqrt %34 : vector<8x1xf32>
    %36 = vector.broadcast %35 : vector<8x1xf32> to vector<8x128xf32>
    %37 = arith.mulf %32, %36 : vector<8x128xf32>
    %c0_18 = arith.constant 0 : index
    %c0_19 = arith.constant 0 : index
    %38 = vector.load %arg6[%c0_18, %c0_19] : memref<1x128xf32, #tpu.memory_space<vmem>>, vector<1x128xf32>
    %39 = vector.broadcast %38 : vector<1x128xf32> to vector<8x128xf32>
    %40 = arith.mulf %37, %39 : vector<8x128xf32>
    %c0_20 = arith.constant 0 : index
    %c0_21 = arith.constant 0 : index
    %41 = vector.load %arg7[%c0_20, %c0_21] : memref<1x128xf32, #tpu.memory_space<vmem>>, vector<1x128xf32>
    %42 = vector.broadcast %41 : vector<1x128xf32> to vector<8x128xf32>
    %43 = arith.addf %40, %42 : vector<8x128xf32>
    %c0_22 = arith.constant 0 : index
    %c0_23 = arith.constant 0 : index
    %44 = vector.load %arg8[%c0_22, %c0_23] : memref<8x128xf32, #tpu.memory_space<vmem>>, vector<8x128xf32>
    tpu.vector_store %arg8[%c0_22, %c0_23], %43 {strides = array<i32>} : memref<8x128xf32, #tpu.memory_space<vmem>>, vector<8x128xf32>,
    return
  }
  func.func @transform_0(%arg0: i32) -> (i32, i32) {
    %c0_i32 = arith.constant 0 : i32
    %c0_i32_0 = arith.constant 0 : i32
    return %arg0, %c0_i32 : i32, i32
  }
  func.func @transform_1(%arg0: i32) -> (i32, i32) {
    %c0_i32 = arith.constant 0 : i32
    %c0_i32_0 = arith.constant 0 : i32
    %c0_i32_1 = arith.constant 0 : i32
    return %c0_i32, %c0_i32_0 : i32, i32
  }
  func.func @transform_2(%arg0: i32) -> (i32, i32) {
    %c0_i32 = arith.constant 0 : i32
    %c0_i32_0 = arith.constant 0 : i32
    %c0_i32_1 = arith.constant 0 : i32
    return %c0_i32, %c0_i32_0 : i32, i32
  }
  func.func @transform_3(%arg0: i32) -> (i32, i32) {
    %c0_i32 = arith.constant 0 : i32
    %c0_i32_0 = arith.constant 0 : i32
    %c0_i32_1 = arith.constant 0 : i32
    return %c0_i32, %c0_i32_0 : i32, i32
  }
  func.func @transform_4(%arg0: i32) -> (i32, i32) {
    %c0_i32 = arith.constant 0 : i32
    %c0_i32_0 = arith.constant 0 : i32
    %c0_i32_1 = arith.constant 0 : i32
    return %c0_i32, %c0_i32_0 : i32, i32
  }
  func.func @transform_5(%arg0: i32) -> (i32, i32) {
    %c0_i32 = arith.constant 0 : i32
    %c0_i32_0 = arith.constant 0 : i32
    %c0_i32_1 = arith.constant 0 : i32
    return %c0_i32, %c0_i32_0 : i32, i32
  }
  func.func @transform_6(%arg0: i32) -> (i32, i32) {
    %c0_i32 = arith.constant 0 : i32
    %c0_i32_0 = arith.constant 0 : i32
    %c0_i32_1 = arith.constant 0 : i32
    return %c0_i32, %c0_i32_0 : i32, i32
  }
  func.func @transform_7(%arg0: i32) -> (i32, i32) {
    %c0_i32 = arith.constant 0 : i32
    %c0_i32_0 = arith.constant 0 : i32
    return %arg0, %c0_i32 : i32, i32
  }
}

</mosaic_0001>

<bundles_post_ra>
// kernel: contrastive_projector.1
= control target key start
LH: loop header
LB: loop body
LE: loop exit
PB: predicated region body
PF: predicated region fallthrough
CT: control target
= control target key end

     0   :  { %v353_v1 = vmov 0.0   ;;  %vm354_vm0 = vmmov 0   ;;  %vm52_vm1 = vcmask 261120   ;;  %s453_s0 = inlined_call_operand.vmem [shape: bf16[8,32], index: 0, kind: input, shape index: {}]   ;;  %s454_s1 = inlined_call_operand.vmem [shape: bf16[32,128], index: 1, kind: input, shape index: {}]   ;;  %s455_s2 = inlined_call_operand.vmem [shape: f32[1,128], index: 2, kind: input, shape index: {}]   ;;  %s456_s3 = inlined_call_operand.vmem [shape: bf16[128,128], index: 3, kind: input, shape index: {}]   ;;  %s457_s4 = inlined_call_operand.vmem [shape: f32[1,128], index: 4, kind: input, shape index: {}]   ;;  %s458_s5 = inlined_call_operand.vmem [shape: f32[1,128], index: 5, kind: input, shape index: {}]   ;;  %s459_s6 = inlined_call_operand.vmem [shape: f32[1,128], index: 6, kind: input, shape index: {}]   ;;  %s460_s7 = inlined_call_operand.hbm [shape: f32[8,128], index: 7, kind: output, shape index: {}]  }
   0x1   :  { %v315_v0 = vld [vmem:[%s454_s1] sm:$0xff]   ;;  %284 = vmatprep.subr.bf16.mxu0 %v353_v1  ;;  %292 = vmatprep.subr.bf16.mxu1 %v353_v1  ;;  %v316_v2 = vld [vmem:[%s454_s1 + $0x8] sm:$0xff]   ;;  %v319_v6 = vld [vmem:[%s456_s3 + $0x10] sm:$0xff]  }
   0x2   :  { %285 = vmatpush3.bf16.msra.mxu0 %v315_v0  ;;  %288 = vmatprep.mubr.msk.bf16.mxu0 %vm354_vm0, %v353_v1  ;;  %v317_v3 = vld [vmem:[%s456_s3] sm:$0xff]   ;;  %v318_v4 = vld [vmem:[%s456_s3 + $0x8] sm:$0xff]  }
   0x3   :  { %286 = vmatprep.subr.bf16.mxu0 %v353_v1  ;;  %308 = vmatprep.mubr.msk.bf16.mxu1 %vm354_vm0, %v353_v1  ;;  %v28_v5 = vld [vmem:[%s453_s0] sm:$0xf] }
   0x4   :  { %293 = vmatpush3.bf16.msra.mxu1 %v317_v3 }
   0x5   :  { %294 = vmatprep.subr.bf16.mxu1 %v353_v1 }
   0x6   :  { %287 = vmatpush3.bf16.msra.mxu0 %v316_v2 }
   0x8   :  { %295 = vmatpush3.bf16.msra.mxu1 %v318_v4 }
   0x9   :  { %289 = vmatmul.mubr.msk.bf16.vlgmr.msra.gmra.mrb[0].mxu0 %vm52_vm1, %v28_v5  ;;  %296 = vmatprep.subr.bf16.mxu1 %v353_v1 }
   0xa   :  { %12 = vsyncpa [#allocation3], 0  ;;  %v320_v7 = vld [vmem:[%s456_s3 + $0x18] sm:$0xff]   ;;  %v321_v8 = vld [vmem:[%s456_s3 + $0x20] sm:$0xff]   ;;  %s355_s26 = smov [#allocation2]  }
   0xb   :  { %v322_v9 = vld [vmem:[%s456_s3 + $0x28] sm:$0xff]   ;;  %v323_v10 = vld [vmem:[%s456_s3 + $0x30] sm:$0xff]   ;;  %v324_v11 = vld [vmem:[%s456_s3 + $0x38] sm:$0xff]   ;;  %s249_s27 = sshll.u32 %s355_s26, 4  ;;  %s250_s27 = int_to_ptr.vmem [resolvable:$true] %s249_s27 }
   0xc   :  { %297 = vmatpush3.bf16.msra.mxu1 %v319_v6  ;;  %v257_v12 = vld [vmem:[%s455_s2] ss:$0 sm:$0xff]  ;;  %s329_s28 = scalar_lea.vmem %s250_s27, 128  ;;  %p334_p1 = scmp.lt.s32.totalorder %s250_s27, %s250_s27 }
   0xd   :  { %298 = vmatprep.subr.bf16.mxu1 %v353_v1  ;;  %v261_v24 = vld [vmem:[%s457_s4] ss:$0 sm:$0xff]  ;;  %p330_p0 = scmp.ne.s32.totalorder %s250_s27, %s329_s28  ;;  %p335_p2 = scmp.lt.s32.totalorder %s329_s28, %s329_s28 }
   0xe   :  { %v270_v40 = vld [vmem:[%s458_s5] ss:$0 sm:$0xff] }
   0xf   :  { %v271_v42 = vld [vmem:[%s459_s6] ss:$0 sm:$0xff]  ;;  %p336_p3 = por %p335_p2, %p334_p1 }
  0x10   :  { %299 = vmatpush3.bf16.msra.mxu1 %v320_v7 }
  0x11   :  { %300 = vmatprep.subr.bf16.mxu1 %v353_v1  ;;  %p337_p4 = pnand %p336_p3, %p330_p0 }
  0x14   :  { %301 = vmatpush3.bf16.msra.mxu1 %v321_v8 }
  0x15   :  { %302 = vmatprep.subr.bf16.mxu1 %v353_v1 }
  0x18   :  { %303 = vmatpush3.bf16.msra.mxu1 %v322_v9 }
  0x19   :  { %304 = vmatprep.subr.bf16.mxu1 %v353_v1 }
  0x1c   :  { %305 = vmatpush3.bf16.msra.mxu1 %v323_v10 }
  0x1d   :  { %306 = vmatprep.subr.bf16.mxu1 %v353_v1 }
  0x20   :  { %307 = vmatpush3.bf16.msra.mxu1 %v324_v11 }
  0xdc   :  { %v90_v13 = vpop.f32.mrb[0].mxu0 }
  0xdd   :  { %v91_v14 = vadd.f32 %v257_v12, %v90_v13  ;;  %v290_v15 = vpop.f32.mrb[1].mxu0 }
  0xde   :  { %v93_v16 = vpop.f32.mrb[2].mxu0 }
  0xdf   :  { %v97_v17 = vmul.f32 0.70710677, %v91_v14  ;;  %v291_v18 = vpop.f32.mrb[3].mxu0  ;;  %v96_v20 = vmul.f32 0.5, %v91_v14 }
  0xe1   :  { %325 = verf.f32 %v97_v17 }
  0xeb   :  { %v326_v19 = vpop.eup %325 }
  0xec   :  { %v99_v21 = vadd.f32 1.0, %v326_v19 }
  0xee   :  { %v100_v22 = vmul.f32 %v99_v21, %v96_v20 }
  0xf0   :  { %v101_v23 = vpack.c.bf16 %v100_v22, %v100_v22 }
  0xf2   :  { %309 = vmatmul.mubr.bf16.vlgmr.msra.gmra.mrb[0].mxu1 %v101_v23 }
 0x1c5   :  { %v207_v25 = vpop.f32.mrb[0].mxu1 }
 0x1c6   :  { %v208_v26 = vadd.f32 %v261_v24, %v207_v25  ;;  %v310_v27 = vpop.f32.mrb[1].mxu1 }
 0x1c7   :  { %v210_v28 = vpop.f32.mrb[2].mxu1 }
 0x1c8   :  { %213 = vadd.xlane.f32.xlu0 %v208_v26  ;;  %v311_v29 = vpop.f32.mrb[3].mxu1  ;;  %v216_v30 = vmul.f32 %v208_v26, %v208_v26 }
 0x1cc   :  { %217 = vadd.xlane.f32.xlu0 %v216_v30 }
 0x255   :  { %v214_v31 = vpop.xlane.xlu0 %213 }
 0x256   :  { %v215_v32 = vmul.f32 0.0625, %v214_v31 }
 0x258   :  { %v220_v34 = vmul.f32 %v215_v32, %v215_v32  ;;  %v222_v38 = vsub.f32 %v208_v26, %v215_v32 }
 0x259   :  { %v218_v33 = vpop.xlane.xlu0 %217 }
 0x25a   :  { %v219_v35 = vmul.f32 0.0625, %v218_v33 }
 0x25c   :  { %v221_v36 = vsub.f32 %v219_v35, %v220_v34 }
 0x25e   :  { %v223_v37 = vadd.f32 1e-05, %v221_v36 }
 0x260   :  { %327 = vrsqrt.f32 %v223_v37 }
 0x26a   :  { %v328_v39 = vpop.eup %327 }
 0x26b   :  { %v225_v41 = vmul.f32 %v328_v39, %v222_v38 }
 0x26d   :  { %v233_v43 = vmul.f32 %v270_v40, %v225_v41 }
 0x26f   :  { %v241_v44 = vadd.f32 %v271_v42, %v233_v43 }
 0x271   :  { %242 = vst [vmem:[#allocation2] sm:$0xff] %v241_v44 }
 0x272   :  { %340 = shalt.err (!%p337_p4)
}
 0x273   :  { %s341_s30 = scalar_lea.hbm %s460_s7, 128 }
 0x274   :  { %p342_p5 = scmp.ne.s32.totalorder %s460_s7, %s341_s30  ;;  %p345_p6 = scmp.lt.u32.totalorder %s341_s30, %s460_s7 }
 0x276   :  { %p347_p7 = pnand %p345_p6, %p342_p5 }
 0x278   :  { %350 = shalt.err (!%p347_p7)
}
 0x279   :  { %252 = dma.vmem_to_hbm [thread:$0]  %s250_s27, 128, %s460_s7, [#allocation3]  }
 0x27a   :  { %351 = dma.done.wait [#allocation3], 128  }
 0x27b   :  { %352 = vsyncadd [#allocation3], 4294967168 }
 0x27c   :  { %256 = vsyncpa [#allocation3], 1 }

</bundles_post_ra>
